<compile_context>
chip_gen: v7x
topology: tpu7x:2x2x1
jax: 0.10.0
libtpu: 0.0.40
codegen_flags: <defaults>
</compile_context>

<pallas_src>
import functools

import jax
import jax.numpy as jnp
from jax.experimental import pallas as pl
from jax.experimental.pallas import tpu as pltpu


def _round_up(a, b):
    return ((a + b - 1) // b) * b


# ------------------------- fused model+criterion kernel ----------------------
def _fused_mlp_ce_kernel(x_ref, y_ref, w1_ref, b1_ref, w2_ref, b2_ref,
                         logits_ref, partial_ref, *, n_rows):
    i = pl.program_id(0)
    tile_n = x_ref.shape[0]

    # ---- model: 2-layer MLP (bf16 MXU operands, f32 accumulation) ----
    xb = x_ref[...].astype(jnp.bfloat16)                    # in-kernel cast (hidden under MXU/DMA)
    h = jnp.dot(xb, w1_ref[...], preferred_element_type=jnp.float32)
    h = jnp.maximum(h + b1_ref[...], 0.0).astype(jnp.bfloat16)   # bf16 hidden, fused f32 epilogue
    logits = jnp.dot(h, w2_ref[...], preferred_element_type=jnp.float32)
    logits = logits + b2_ref[...]                           # [tile_n, C] f32
    logits_ref[...] = logits.astype(logits_ref.dtype)       # bf16 writeback

    # ---- criterion: cross-entropy partial sum (no one-hot, no carried acc) ----
    y = y_ref[...]                                          # [tile_n, 1] int32
    m = jnp.max(logits, axis=-1, keepdims=True)
    z = logits - m
    lse = jnp.log(jnp.sum(jnp.exp(z), axis=-1, keepdims=True))
    cols = jax.lax.broadcasted_iota(jnp.int32, logits.shape, 1)
    picked = jnp.sum(jnp.where(cols == y, z, 0.0), axis=-1, keepdims=True)
    nll = lse - picked                                      # [tile_n, 1]

    # Row-index mask for the (possibly partial) last tile; jnp.where (not *)
    # so garbage/NaN from out-of-bounds rows cannot contaminate the sum.
    rows = i * tile_n + jax.lax.broadcasted_iota(jnp.int32, (tile_n, 1), 0)
    tile_sum = jnp.sum(jnp.where(rows < n_rows, nll, 0.0))
    partial_ref[...] = jnp.broadcast_to(tile_sum, partial_ref.shape)


def fused_mlp_cross_entropy(x2d, y1d, w1, b1, w2, b2, *, tile_n_target=2048):
    n, d = x2d.shape
    h_dim = w1.shape[1]
    c = w2.shape[1]

    try:
        vmem_cap = int(pltpu.get_tpu_info().vmem_capacity_bytes)
    except Exception:
        vmem_cap = 64 * 1024 * 1024          # conservative fallback (v7x per-TC)

    # Weights are tiny & VMEM-resident: cast once in the wrapper. x stays f32.
    w1_bf16 = w1.astype(jnp.bfloat16)
    w2_bf16 = w2.astype(jnp.bfloat16)
    b1_f32 = b1.reshape(1, h_dim).astype(jnp.float32)
    b2_f32 = b2.reshape(1, c).astype(jnp.float32)
    y2d = y1d.reshape(n, 1).astype(jnp.int32)

    # ---- choose a row tile that keeps the double-buffered working set in VMEM ----
    def vmem_estimate(t):
        resident = 2 * (2 * (d * h_dim + h_dim * c) + 4 * (h_dim + c))       # bf16 weights + f32 biases (dbl-buf)
        tiles = 2 * (4 * t * d + 4 * t + 2 * t * c + 4 * 128)                # dbl-buf x(f32), y, logits(bf16), partial
        interm = 2 * t * d + 4 * t * h_dim + 2 * t * h_dim + 3 * 4 * t * c   # xb, h(f32+bf16), f32 logits + CE temps
        return resident + tiles + interm

    vmem_budget = max(16 * 1024 * 1024, int(0.45 * vmem_cap))  # ~28 MiB v7x, ~57 MiB v5e/v6e
    tile_n = _round_up(min(tile_n_target, _round_up(n, 8)), 8)
    while tile_n > 8 and vmem_estimate(tile_n) > vmem_budget:
        tile_n = _round_up(tile_n // 2, 8)
    # TODO(synk): add a second grid axis over C with a streaming log-sum-exp once
    # C is vocab-scale; at huge H/C the shrink loop above bottoms out at tile_n=8.

    num_tiles = pl.cdiv(n, tile_n)
    kernel = functools.partial(_fused_mlp_ce_kernel, n_rows=n)

    n_pad = num_tiles * tile_n
    cost = pl.CostEstimate(
        flops=2 * n_pad * (d * h_dim + h_dim * c),
        transcendentals=n_pad * (c + 1),
        bytes_accessed=(4 * n * d + 4 * n
                        + 2 * (d * h_dim + h_dim * c) + 4 * (h_dim + c)
                        + 2 * n * c + 4 * num_tiles * 128))

    vmem_limit = int(min(0.75 * vmem_cap,
                         max(32 * 1024 * 1024, 2 * vmem_estimate(tile_n))))

    # TODO(synk): pipeline_mode=pl.Buffered(1) on the constant-index weight specs
    # would halve their VMEM footprint once H/C grow (negligible at these sizes).
    logits, partials = pl.pallas_call(
        kernel,
        out_shape=(
            jax.ShapeDtypeStruct((n, c), jnp.bfloat16),            # bf16 logits
            jax.ShapeDtypeStruct((num_tiles, 1, 128), jnp.float32),  # per-tile NLL sums
        ),
        grid=(num_tiles,),
        in_specs=[
            pl.BlockSpec((tile_n, d), lambda i: (i, 0)),      # x rows (pipelined, f32)
            pl.BlockSpec((tile_n, 1), lambda i: (i, 0)),      # labels (pipelined)
            pl.BlockSpec((d, h_dim), lambda i: (0, 0)),       # w1     (resident)
            pl.BlockSpec((1, h_dim), lambda i: (0, 0)),       # b1     (resident)
            pl.BlockSpec((h_dim, c), lambda i: (0, 0)),       # w2     (resident)
            pl.BlockSpec((1, c), lambda i: (0, 0)),           # b2     (resident)
        ],
        out_specs=(
            pl.BlockSpec((tile_n, c), lambda i: (i, 0)),      # logits
            pl.BlockSpec((1, 1, 128), lambda i: (i, 0, 0)),   # partial NLL sums
        ),
        compiler_params=pltpu.CompilerParams(
            dimension_semantics=("parallel",),                # no carried state -> v7x 2-TC sharding
            vmem_limit_bytes=vmem_limit,
        ),
        cost_estimate=cost,
    )(x2d, y2d, w1_bf16, b1_f32, w2_bf16, b2_f32)

    # Tiny final reduction in plain JAX (keeps the kernel grid axis "parallel").
    # Note: mean over all n rows (PyTorch default CE, no ignore_index semantics).
    loss = jnp.sum(partials[:, 0, 0]) / n
    return logits, loss


# ------------------------ TH_TrainModelFace wrapper --------------------------
class TrainModelFace:
    """JAX/Pallas analogue of TH_TrainModelFace: composes model + criterion.

    model.train_forward and criterion.train_forward are fused into a single
    Pallas kernel; the returned dict matches the original composition
    (input_data fields + "logits" + "loss").
    """

    def __init__(self, params, num_classes):
        self.params = params
        self.num_classes = num_classes

    def __call__(self, input_data, valid=False):
        # valid=True in the original only wraps the same math in no_grad();
        # forward semantics are identical, so the flag is accepted and ignored.
        x = input_data["x"]                       # [B, T, D] float32
        y = input_data["y"]                       # [B, T] int32
        b, t, d = x.shape
        p = self.params
        logits2d, loss = fused_mlp_cross_entropy(
            x.reshape(b * t, d), y.reshape(b * t),
            p["w1"], p["b1"], p["w2"], p["b2"])

        data = {}
        data.update(input_data)                                             # input_data
        data.update({"logits": logits2d.reshape(b, t, self.num_classes)})   # model out
        data.update({"loss": loss})                                         # criterion out
        return data


# ----------------------------------- main ------------------------------------
if __name__ == "__main__":
    # D/H/C multiples of 256: lane-dense everywhere and full-width on the
    # 256-wide v6e/v7x MXU (128 multiples already native on v5e).
    B, T, D, H, C = 2, 8, 256, 256, 256

    key = jax.random.PRNGKey(0)
    k_x, k_y, k_w1, k_b1, k_w2, k_b2 = jax.random.split(key, 6)

    params = {
        "w1": jax.random.normal(k_w1, (D, H), dtype=jnp.float32) * 0.1,
        "b1": jax.random.normal(k_b1, (1, H), dtype=jnp.float32) * 0.05,
        "w2": jax.random.normal(k_w2, (H, C), dtype=jnp.float32) * 0.1,
        "b2": jax.random.normal(k_b2, (1, C), dtype=jnp.float32) * 0.05,
    }

    x = jax.random.normal(k_x, (B, T, D), dtype=jnp.float32)
    y = jax.random.randint(k_y, (B, T), 0, C, dtype=jnp.int32)

    train_model = TrainModelFace(params, num_classes=C)
    out = train_model({"x": x, "y": y}, valid=False)

    jax.block_until_ready(out["loss"])
    jax.block_until_ready(out["logits"])

    assert out["logits"].shape == (B, T, C)
    assert out["loss"].shape == ()

    # Pure-JAX f32 reference — loose tolerance (bf16 matmuls + bf16 logits out).
    x2d = x.reshape(B * T, D)
    h_ref = jnp.maximum(x2d @ params["w1"] + params["b1"], 0.0)
    logits_ref = h_ref @ params["w2"] + params["b2"]
    logp_ref = jax.nn.log_softmax(logits_ref, axis=-1)
    loss_ref = -jnp.mean(jnp.take_along_axis(
        logp_ref, y.reshape(B * T, 1), axis=-1))
    assert jnp.allclose(out["logits"].reshape(B * T, C).astype(jnp.float32),
                        logits_ref, rtol=5e-2, atol=1e-1)
    assert jnp.allclose(out["loss"], loss_ref, rtol=5e-2, atol=5e-2)

    print("KERNEL_OK")
</pallas_src>

<mosaic_0001>
module attributes {stable_mosaic.version = 11 : i64} {
  func.func @_fused_mlp_ce_kernel(%arg0: i32, %arg1: memref<16x256xf32, #tpu.memory_space<vmem>>, %arg2: memref<16x1xi32, #tpu.memory_space<vmem>>, %arg3: memref<256x256xbf16, #tpu.memory_space<vmem>>, %arg4: memref<1x256xf32, #tpu.memory_space<vmem>>, %arg5: memref<256x256xbf16, #tpu.memory_space<vmem>>, %arg6: memref<1x256xf32, #tpu.memory_space<vmem>>, %arg7: memref<16x256xbf16, #tpu.memory_space<vmem>>, %arg8: memref<1x1x128xf32, #tpu.memory_space<vmem>>) attributes {dimension_semantics = [#tpu.dimension_semantics<parallel>], iteration_bounds = array<i64: 1>, scalar_prefetch = 0 : i64, scratch_operands = 0 : i64, tpu.core_type = #tpu.core_type<tc>, window_params = [{transform_indices = @transform_0, window_bounds = array<i64: 16, 256>}, {transform_indices = @transform_1, window_bounds = array<i64: 16, 1>}, {pipeline_mode = #tpu.pipeline_mode<synchronous>, transform_indices = @transform_2, window_bounds = array<i64: 256, 256>}, {pipeline_mode = #tpu.pipeline_mode<synchronous>, transform_indices = @transform_3, window_bounds = array<i64: 1, 256>}, {pipeline_mode = #tpu.pipeline_mode<synchronous>, transform_indices = @transform_4, window_bounds = array<i64: 256, 256>}, {pipeline_mode = #tpu.pipeline_mode<synchronous>, transform_indices = @transform_5, window_bounds = array<i64: 1, 256>}, {transform_indices = @transform_6, window_bounds = array<i64: 16, 256>}, {transform_indices = @transform_7, window_bounds = array<i64: 1, 1, 128>}]} {
    %c0 = arith.constant 0 : index
    %c0_0 = arith.constant 0 : index
    %0 = vector.load %arg1[%c0, %c0_0] : memref<16x256xf32, #tpu.memory_space<vmem>>, vector<16x256xf32>
    %1 = arith.truncf %0 : vector<16x256xf32> to vector<16x256xbf16>
    %c0_1 = arith.constant 0 : index
    %c0_2 = arith.constant 0 : index
    %2 = vector.load %arg3[%c0_1, %c0_2] : memref<256x256xbf16, #tpu.memory_space<vmem>>, vector<256x256xbf16>
    %cst = arith.constant dense<0.000000e+00> : vector<16x256xf32>
    %3 = tpu.matmul %1, %2, %cst {dimension_numbers = #tpu.dot_dimension_numbers<[1], [0], [0], [1], [0, 0, 1, 1], [], []>} : vector<16x256xbf16>, vector<256x256xbf16>, vector<16x256xf32> -> vector<16x256xf32>
    %c0_3 = arith.constant 0 : index
    %c0_4 = arith.constant 0 : index
    %4 = vector.load %arg4[%c0_3, %c0_4] : memref<1x256xf32, #tpu.memory_space<vmem>>, vector<1x256xf32>
    %5 = vector.broadcast %4 : vector<1x256xf32> to vector<16x256xf32>
    %6 = arith.addf %3, %5 : vector<16x256xf32>
    %cst_5 = arith.constant 0.000000e+00 : f32
    %7 = vector.broadcast %cst_5 : f32 to vector<16x256xf32>
    %8 = arith.maximumf %6, %7 : vector<16x256xf32>
    %9 = arith.truncf %8 : vector<16x256xf32> to vector<16x256xbf16>
    %c0_6 = arith.constant 0 : index
    %c0_7 = arith.constant 0 : index
    %10 = vector.load %arg5[%c0_6, %c0_7] : memref<256x256xbf16, #tpu.memory_space<vmem>>, vector<256x256xbf16>
    %cst_8 = arith.constant dense<0.000000e+00> : vector<16x256xf32>
    %11 = tpu.matmul %9, %10, %cst_8 {dimension_numbers = #tpu.dot_dimension_numbers<[1], [0], [0], [1], [0, 0, 1, 1], [], []>} : vector<16x256xbf16>, vector<256x256xbf16>, vector<16x256xf32> -> vector<16x256xf32>
    %c0_9 = arith.constant 0 : index
    %c0_10 = arith.constant 0 : index
    %12 = vector.load %arg6[%c0_9, %c0_10] : memref<1x256xf32, #tpu.memory_space<vmem>>, vector<1x256xf32>
    %13 = vector.broadcast %12 : vector<1x256xf32> to vector<16x256xf32>
    %14 = arith.addf %11, %13 : vector<16x256xf32>
    %15 = arith.truncf %14 : vector<16x256xf32> to vector<16x256xbf16>
    %c0_11 = arith.constant 0 : index
    %c0_12 = arith.constant 0 : index
    %16 = vector.load %arg7[%c0_11, %c0_12] : memref<16x256xbf16, #tpu.memory_space<vmem>>, vector<16x256xbf16>
    tpu.vector_store %arg7[%c0_11, %c0_12], %15 {strides = array<i32>} : memref<16x256xbf16, #tpu.memory_space<vmem>>, vector<16x256xbf16>,
    %c0_13 = arith.constant 0 : index
    %c0_14 = arith.constant 0 : index
    %17 = vector.load %arg2[%c0_13, %c0_14] : memref<16x1xi32, #tpu.memory_space<vmem>>, vector<16x1xi32>
    %cst_15 = arith.constant dense<0xFF800000> : vector<16xf32>
    %18 = vector.multi_reduction <maximumf>, %14, %cst_15 [1] : vector<16x256xf32> to vector<16xf32>
    %19 = vector.shape_cast %18 : vector<16xf32> to vector<16x1xf32>
    %20 = vector.broadcast %19 : vector<16x1xf32> to vector<16x256xf32>
    %21 = arith.subf %14, %20 : vector<16x256xf32>
    %22 = math.exp %21 : vector<16x256xf32>
    %cst_16 = arith.constant dense<0.000000e+00> : vector<16xf32>
    %23 = vector.multi_reduction <add>, %22, %cst_16 [1] : vector<16x256xf32> to vector<16xf32>
    %24 = vector.shape_cast %23 : vector<16xf32> to vector<16x1xf32>
    %25 = math.log %24 : vector<16x1xf32>
    %26 = tpu.iota {dimensions = array<i32: 1>} : vector<16x256xi32>
    %27 = vector.broadcast %17 : vector<16x1xi32> to vector<16x256xi32>
    %28 = arith.cmpi eq, %26, %27 : vector<16x256xi32>
    %cst_17 = arith.constant 0.000000e+00 : f32
    %29 = vector.broadcast %cst_17 : f32 to vector<16x256xf32>
    %30 = arith.select %28, %21, %29 : vector<16x256xi1>, vector<16x256xf32>
    %cst_18 = arith.constant dense<0.000000e+00> : vector<16xf32>
    %31 = vector.multi_reduction <add>, %30, %cst_18 [1] : vector<16x256xf32> to vector<16xf32>
    %32 = vector.shape_cast %31 : vector<16xf32> to vector<16x1xf32>
    %33 = arith.subf %25, %32 : vector<16x1xf32>
    %c16_i32 = arith.constant 16 : i32
    %34 = arith.muli %arg0, %c16_i32 : i32
    %35 = tpu.iota {dimensions = array<i32: 0>} : vector<16x1xi32>
    %36 = vector.broadcast %34 : i32 to vector<16x1xi32>
    %37 = arith.addi %36, %35 : vector<16x1xi32>
    %c16_i32_19 = arith.constant 16 : i32
    %38 = vector.broadcast %c16_i32_19 : i32 to vector<16x1xi32>
    %39 = arith.cmpi slt, %37, %38 : vector<16x1xi32>
    %cst_20 = arith.constant 0.000000e+00 : f32
    %40 = vector.broadcast %cst_20 : f32 to vector<16x1xf32>
    %41 = arith.select %39, %33, %40 : vector<16x1xi1>, vector<16x1xf32>
    %42 = vector.shape_cast %41 : vector<16x1xf32> to vector<1x16x1xf32>
    %cst_21 = arith.constant dense<0.000000e+00> : vector<1xf32>
    %43 = vector.multi_reduction <add>, %42, %cst_21 [1, 2] : vector<1x16x1xf32> to vector<1xf32>
    %44 = vector.shape_cast %43 : vector<1xf32> to vector<1x1x1xf32>
    %45 = vector.extract %44[0, 0, 0] : f32 from vector<1x1x1xf32>
    %46 = vector.broadcast %45 : f32 to vector<1x1x128xf32>
    %c0_22 = arith.constant 0 : index
    %c0_23 = arith.constant 0 : index
    %c0_24 = arith.constant 0 : index
    %47 = vector.load %arg8[%c0_22, %c0_23, %c0_24] : memref<1x1x128xf32, #tpu.memory_space<vmem>>, vector<1x1x128xf32>
    tpu.vector_store %arg8[%c0_22, %c0_23, %c0_24], %46 {strides = array<i32>} : memref<1x1x128xf32, #tpu.memory_space<vmem>>, vector<1x1x128xf32>,
    return
  }
  func.func @transform_0(%arg0: i32) -> (i32, i32) {
    %c0_i32 = arith.constant 0 : i32
    %c0_i32_0 = arith.constant 0 : i32
    return %arg0, %c0_i32 : i32, i32
  }
  func.func @transform_1(%arg0: i32) -> (i32, i32) {
    %c0_i32 = arith.constant 0 : i32
    %c0_i32_0 = arith.constant 0 : i32
    return %arg0, %c0_i32 : i32, i32
  }
  func.func @transform_2(%arg0: i32) -> (i32, i32) {
    %c0_i32 = arith.constant 0 : i32
    %c0_i32_0 = arith.constant 0 : i32
    %c0_i32_1 = arith.constant 0 : i32
    return %c0_i32, %c0_i32_0 : i32, i32
  }
  func.func @transform_3(%arg0: i32) -> (i32, i32) {
    %c0_i32 = arith.constant 0 : i32
    %c0_i32_0 = arith.constant 0 : i32
    %c0_i32_1 = arith.constant 0 : i32
    return %c0_i32, %c0_i32_0 : i32, i32
  }
  func.func @transform_4(%arg0: i32) -> (i32, i32) {
    %c0_i32 = arith.constant 0 : i32
    %c0_i32_0 = arith.constant 0 : i32
    %c0_i32_1 = arith.constant 0 : i32
    return %c0_i32, %c0_i32_0 : i32, i32
  }
  func.func @transform_5(%arg0: i32) -> (i32, i32) {
    %c0_i32 = arith.constant 0 : i32
    %c0_i32_0 = arith.constant 0 : i32
    %c0_i32_1 = arith.constant 0 : i32
    return %c0_i32, %c0_i32_0 : i32, i32
  }
  func.func @transform_6(%arg0: i32) -> (i32, i32) {
    %c0_i32 = arith.constant 0 : i32
    %c0_i32_0 = arith.constant 0 : i32
    return %arg0, %c0_i32 : i32, i32
  }
  func.func @transform_7(%arg0: i32) -> (i32, i32, i32) {
    %c0_i32 = arith.constant 0 : i32
    %c0_i32_0 = arith.constant 0 : i32
    %c0_i32_1 = arith.constant 0 : i32
    return %arg0, %c0_i32, %c0_i32_0 : i32, i32, i32
  }
}

</mosaic_0001>

<bundles_post_ra>
// kernel: tpu_custom_call.1
= control target key start
LH: loop header
LB: loop body
LE: loop exit
PB: predicated region body
PF: predicated region fallthrough
CT: control target
= control target key end

     0   :  { %13 = vsyncpa [#allocation3], 0  ;;  %s1140_s0 = inlined_call_operand.hbm [shape: f32[16,256], index: 0, kind: input, shape index: {}]   ;;  %s1141_s1 = inlined_call_operand.vmem [shape: s32[16,1], index: 1, kind: input, shape index: {}]   ;;  %s1142_s2 = inlined_call_operand.hbm [shape: bf16[256,256], index: 2, kind: input, shape index: {}]   ;;  %s1143_s3 = inlined_call_operand.vmem [shape: f32[1,256], index: 3, kind: input, shape index: {}]   ;;  %s1144_s4 = inlined_call_operand.hbm [shape: bf16[256,256], index: 4, kind: input, shape index: {}]   ;;  %s1145_s5 = inlined_call_operand.vmem [shape: f32[1,256], index: 5, kind: input, shape index: {}]   ;;  %s1146_s6 = inlined_call_operand.hbm [shape: bf16[16,256], index: 6, kind: output, shape index: {0}]   ;;  %s1147_s7 = inlined_call_operand.hbm [shape: f32[1,1,128], index: 7, kind: output, shape index: {1}]  }
   0x1   :  { %14 = vsyncpa [#allocation6], 0 }
   0x2   :  { %15 = vsyncpa [#allocation4], 0 }
   0x3   :  { %16 = vsyncpa [#allocation10], 0  ;;  %s1009_s24 = smov [#allocation5]   ;;  %s891_s28 = scalar_lea.hbm %s1142_s2, 4096 }
   0x4   :  { %s36_s25 = sshll.u32 %s1009_s24, 4  ;;  %p892_p0 = scmp.ne.s32.totalorder %s1142_s2, %s891_s28  ;;  %s37_s25 = int_to_ptr.vmem [resolvable:$true] %s36_s25 }
   0x5   :  { %p895_p1 = scmp.lt.u32.totalorder %s891_s28, %s1142_s2 }
   0x7   :  { %p897_p2 = pnand %p895_p1, %p892_p0 }
   0x9   :  { %900 = shalt.err (!%p897_p2)
}
   0xa   :  { %s901_s10 = scalar_lea.vmem %s37_s25, 4096  ;;  %p906_p4 = scmp.lt.s32.totalorder %s37_s25, %s37_s25 }
   0xb   :  { %p902_p3 = scmp.ne.s32.totalorder %s37_s25, %s901_s10  ;;  %p907_p5 = scmp.lt.s32.totalorder %s901_s10, %s901_s10 }
   0xd   :  { %p908_p6 = por %p907_p5, %p906_p4 }
   0xf   :  { %p909_p7 = pnand %p908_p6, %p902_p3 }
  0x11   :  { %912 = shalt.err (!%p909_p7)
}
  0x12   :  { %s1010_s11 = smov 128   ;;  %s1011_s12 = smov 8  }
  0x13   :  { %42 = dma.hbm_to_vmem [thread:$0]  %s1142_s2, 4096, %s37_s25, [#allocation6], %s1010_s11, %s1010_s11, %s1011_s12  }
  0x14   :  { %s1012_s15 = smov [#allocation2]   ;;  %s913_s19 = scalar_lea.hbm %s1140_s0, 512 }
  0x15   :  { %s22_s16 = sshll.u32 %s1012_s15, 4  ;;  %p914_p8 = scmp.ne.s32.totalorder %s1140_s0, %s913_s19  ;;  %s23_s16 = int_to_ptr.vmem [resolvable:$true] %s22_s16 }
  0x16   :  { %p917_p9 = scmp.lt.u32.totalorder %s913_s19, %s1140_s0 }
  0x18   :  { %p919_p10 = pnand %p917_p9, %p914_p8 }
  0x1a   :  { %922 = shalt.err (!%p919_p10)
}
  0x1b   :  { %s923_s24 = scalar_lea.vmem %s23_s16, 512  ;;  %p928_p12 = scmp.lt.s32.totalorder %s23_s16, %s23_s16 }
  0x1c   :  { %p924_p11 = scmp.ne.s32.totalorder %s23_s16, %s923_s24  ;;  %p929_p13 = scmp.lt.s32.totalorder %s923_s24, %s923_s24 }
  0x1e   :  { %p930_p0 = por %p929_p13, %p928_p12 }
  0x20   :  { %p931_p1 = pnand %p930_p0, %p924_p11 }
  0x22   :  { %934 = shalt.err (!%p931_p1)
}
  0x23   :  { %s1013_s2 = smov 256   ;;  %s1014_s25 = smov 16  }
  0x24   :  { %28 = dma.hbm_to_vmem [thread:$0]  %s1140_s0, 512, %s23_s16, [#allocation3], %s1013_s2, %s1013_s2, %s1014_s25  }
  0x25   :  { %s1015_s28 = smov [#allocation7]   ;;  %s935_s9 = scalar_lea.hbm %s1144_s4, 4096 }
  0x26   :  { %s50_s29 = sshll.u32 %s1015_s28, 4  ;;  %p936_p2 = scmp.ne.s32.totalorder %s1144_s4, %s935_s9  ;;  %s51_s29 = int_to_ptr.vmem [resolvable:$true] %s50_s29 }
  0x27   :  { %p939_p3 = scmp.lt.u32.totalorder %s935_s9, %s1144_s4 }
  0x29   :  { %p941_p4 = pnand %p939_p3, %p936_p2 }
  0x2b   :  { %944 = shalt.err (!%p941_p4)
}
  0x2c   :  { %s945_s17 = scalar_lea.vmem %s51_s29, 4096  ;;  %p950_p6 = scmp.lt.s32.totalorder %s51_s29, %s51_s29 }
  0x2d   :  { %p946_p5 = scmp.ne.s32.totalorder %s51_s29, %s945_s17  ;;  %p951_p7 = scmp.lt.s32.totalorder %s945_s17, %s945_s17 }
  0x2f   :  { %p952_p8 = por %p951_p7, %p950_p6 }
  0x31   :  { %p953_p9 = pnand %p952_p8, %p946_p5 }
  0x33   :  { %956 = shalt.err (!%p953_p9)
}
  0x34   :  { %56 = dma.hbm_to_vmem [thread:$0]  %s1144_s4, 4096, %s51_s29, [#allocation6], %s1010_s11, %s1010_s11, %s1011_s12  }
  0x35   :  { %1001 = dma.done.wait [#allocation3], 512  }
  0x36   :  { %1002 = vsyncadd [#allocation3], 4294966784 }
  0x37   :  { %1003 = dma.done.wait [#allocation6], 8192  }
  0x38   :  { %1004 = vsyncadd [#allocation6], 4294959104  ;;  %v783_v0 = vld [vmem:[#allocation5 + $0x4] ss:$8 sps:$4 sm:$0xff]   ;;  %v785_v1 = vld [vmem:[#allocation5] ss:$8 sps:$4 sm:$0xff]  }
  0x39   :  { %278 = vmatprep.subr.bf16.mxu0 %v783_v0  ;;  %v786_v2 = vld [vmem:[#allocation5 + $0x14] ss:$8 sps:$4 sm:$0xff]   ;;  %v788_v3 = vld [vmem:[#allocation5 + $0x10] ss:$8 sps:$4 sm:$0xff]   ;;  %v789_v4 = vld [vmem:[#allocation5 + $0x24] ss:$8 sps:$4 sm:$0xff]  }
  0x3a   :  { %279 = vmatpush1.bf16.msra.mxu0 %v785_v1  ;;  %v791_v5 = vld [vmem:[#allocation5 + $0x20] ss:$8 sps:$4 sm:$0xff]   ;;  %v792_v6 = vld [vmem:[#allocation5 + $0x34] ss:$8 sps:$4 sm:$0xff]   ;;  %v794_v7 = vld [vmem:[#allocation5 + $0x30] ss:$8 sps:$4 sm:$0xff]  }
  0x3b   :  { %280 = vmatprep.subr.bf16.mxu0 %v786_v2  ;;  %v795_v8 = vld [vmem:[#allocation5 + $0x44] ss:$8 sps:$4 sm:$0xff]   ;;  %v797_v9 = vld [vmem:[#allocation5 + $0x40] ss:$8 sps:$4 sm:$0xff]   ;;  %v798_v10 = vld [vmem:[#allocation5 + $0x54] ss:$8 sps:$4 sm:$0xff]  }
  0x3c   :  { %v800_v11 = vld [vmem:[#allocation5 + $0x50] ss:$8 sps:$4 sm:$0xff]   ;;  %v801_v12 = vld [vmem:[#allocation5 + $0x64] ss:$8 sps:$4 sm:$0xff]   ;;  %v803_v15 = vld [vmem:[#allocation5 + $0x60] ss:$8 sps:$4 sm:$0xff]  }
  0x3d   :  { %v69_v13 = vld [vmem:[#allocation2 + $0x8] sm:$0xff]  ;;  %v71_v14 = vld [vmem:[#allocation2 + $0x18] sm:$0xff]  ;;  %v68_v55 = vld [vmem:[#allocation2] sm:$0xff]  ;;  %vm654_vm4 = vcmask 7168  }
  0x3e   :  { %281 = vmatpush1.bf16.msra.mxu0 %v788_v3  ;;  %v804_v16 = vld [vmem:[#allocation5 + $0x74] ss:$8 sps:$4 sm:$0xff]   ;;  %v73_v17 = vpack.c.bf16 %v71_v14, %v69_v13  ;;  %v831_v18 = vld [vmem:[#allocation7 + $0x4] ss:$8 sps:$4 sm:$0xff]   ;;  %v833_v19 = vld [vmem:[#allocation7] ss:$8 sps:$4 sm:$0xff]  }
  0x3f   :  { %282 = vmatprep.subr.bf16.mxu0 %v789_v4  ;;  %v834_v20 = vld [vmem:[#allocation7 + $0x14] ss:$8 sps:$4 sm:$0xff]   ;;  %531 = vmatprep.subr.bf16.mxu1 %v831_v18  ;;  %v836_v21 = vld [vmem:[#allocation7 + $0x10] ss:$8 sps:$4 sm:$0xff]   ;;  %v837_v23 = vld [vmem:[#allocation7 + $0x24] ss:$8 sps:$4 sm:$0xff]  }
  0x40   :  { %310 = vmatprep.mubr.bf16.mxu0 %v73_v17  ;;  %532 = vmatpush1.bf16.msra.mxu1 %v833_v19  ;;  %v806_v22 = vld [vmem:[#allocation5 + $0x70] ss:$8 sps:$4 sm:$0xff]   ;;  %v807_v24 = vld [vmem:[#allocation5 + $0x84] ss:$8 sps:$4 sm:$0xff]   ;;  %v839_v25 = vld [vmem:[#allocation7 + $0x20] ss:$8 sps:$4 sm:$0xff]  }
  0x41   :  { %533 = vmatprep.subr.bf16.mxu1 %v834_v20  ;;  %v809_v26 = vld [vmem:[#allocation5 + $0x80] ss:$8 sps:$4 sm:$0xff]   ;;  %v840_v27 = vld [vmem:[#allocation7 + $0x34] ss:$8 sps:$4 sm:$0xff]   ;;  %v842_v29 = vld [vmem:[#allocation7 + $0x30] ss:$8 sps:$4 sm:$0xff]  }
  0x42   :  { %283 = vmatpush1.bf16.msra.mxu0 %v791_v5  ;;  %v810_v28 = vld [vmem:[#allocation5 + $0x94] ss:$8 sps:$4 sm:$0xff]   ;;  %v812_v30 = vld [vmem:[#allocation5 + $0x90] ss:$8 sps:$4 sm:$0xff]   ;;  %v843_v31 = vld [vmem:[#allocation7 + $0x44] ss:$8 sps:$4 sm:$0xff]  }
  0x43   :  { %284 = vmatprep.subr.bf16.mxu0 %v792_v6  ;;  %v813_v32 = vld [vmem:[#allocation5 + $0xa4] ss:$8 sps:$4 sm:$0xff]   ;;  %v845_v33 = vld [vmem:[#allocation7 + $0x40] ss:$8 sps:$4 sm:$0xff]   ;;  %v846_v35 = vld [vmem:[#allocation7 + $0x54] ss:$8 sps:$4 sm:$0xff]   ;;  %v108_v6 = vlaneseq }
  0x44   :  { %534 = vmatpush1.bf16.msra.mxu1 %v836_v21  ;;  %v815_v34 = vld [vmem:[#allocation5 + $0xa0] ss:$8 sps:$4 sm:$0xff]   ;;  %v816_v36 = vld [vmem:[#allocation5 + $0xb4] ss:$8 sps:$4 sm:$0xff]   ;;  %v848_v37 = vld [vmem:[#allocation7 + $0x50] ss:$8 sps:$4 sm:$0xff]  }
  0x45   :  { %535 = vmatprep.subr.bf16.mxu1 %v837_v23  ;;  %v818_v38 = vld [vmem:[#allocation5 + $0xb0] ss:$8 sps:$4 sm:$0xff]   ;;  %v849_v39 = vld [vmem:[#allocation7 + $0x64] ss:$8 sps:$4 sm:$0xff]   ;;  %v851_v41 = vld [vmem:[#allocation7 + $0x60] ss:$8 sps:$4 sm:$0xff]  }
  0x46   :  { %285 = vmatpush1.bf16.msra.mxu0 %v794_v7  ;;  %v819_v40 = vld [vmem:[#allocation5 + $0xc4] ss:$8 sps:$4 sm:$0xff]   ;;  %v821_v42 = vld [vmem:[#allocation5 + $0xc0] ss:$8 sps:$4 sm:$0xff]   ;;  %v852_v43 = vld [vmem:[#allocation7 + $0x74] ss:$8 sps:$4 sm:$0xff]  }
  0x47   :  { %286 = vmatprep.subr.bf16.mxu0 %v795_v8  ;;  %v822_v44 = vld [vmem:[#allocation5 + $0xd4] ss:$8 sps:$4 sm:$0xff]   ;;  %v854_v45 = vld [vmem:[#allocation7 + $0x70] ss:$8 sps:$4 sm:$0xff]   ;;  %v855_v47 = vld [vmem:[#allocation7 + $0x84] ss:$8 sps:$4 sm:$0xff]  }
  0x48   :  { %536 = vmatpush1.bf16.msra.mxu1 %v839_v25  ;;  %v824_v46 = vld [vmem:[#allocation5 + $0xd0] ss:$8 sps:$4 sm:$0xff]   ;;  %v825_v48 = vld [vmem:[#allocation5 + $0xe4] ss:$8 sps:$4 sm:$0xff]   ;;  %v857_v49 = vld [vmem:[#allocation7 + $0x80] ss:$8 sps:$4 sm:$0xff]  }
  0x49   :  { %537 = vmatprep.subr.bf16.mxu1 %v840_v27  ;;  %v827_v50 = vld [vmem:[#allocation5 + $0xe0] ss:$8 sps:$4 sm:$0xff]   ;;  %v858_v51 = vld [vmem:[#allocation7 + $0x94] ss:$8 sps:$4 sm:$0xff]   ;;  %v830_v53 = vld [vmem:[#allocation5 + $0xf0] ss:$8 sps:$4 sm:$0xff]  }
  0x4a   :  { %287 = vmatpush1.bf16.msra.mxu0 %v797_v9  ;;  %v828_v52 = vld [vmem:[#allocation5 + $0xf4] ss:$8 sps:$4 sm:$0xff]   ;;  %v860_v54 = vld [vmem:[#allocation7 + $0x90] ss:$8 sps:$4 sm:$0xff]   ;;  %v861_v57 = vld [vmem:[#allocation7 + $0xa4] ss:$8 sps:$4 sm:$0xff]  }
  0x4b   :  { %288 = vmatprep.subr.bf16.mxu0 %v798_v10  ;;  %v70_v56 = vld [vmem:[#allocation2 + $0x10] sm:$0xff]  ;;  %v863_v59 = vld [vmem:[#allocation7 + $0xa0] ss:$8 sps:$4 sm:$0xff]   ;;  %v867_v62 = vld [vmem:[#allocation7 + $0xc4] ss:$8 sps:$4 sm:$0xff]   ;;  %v109_v7 = vshrl.u32 %v108_v6, 7 }
  0x4c   :  { %538 = vmatpush1.bf16.msra.mxu1 %v842_v29  ;;  %v72_v58 = vpack.c.bf16 %v70_v56, %v68_v55  ;;  %v864_v60 = vld [vmem:[#allocation7 + $0xb4] ss:$8 sps:$4 sm:$0xff]   ;;  %v866_v61 = vld [vmem:[#allocation7 + $0xb0] ss:$8 sps:$4 sm:$0xff]   ;;  %v869_v63 = vld [vmem:[#allocation7 + $0xc0] ss:$8 sps:$4 sm:$0xff]  }
  0x4d   :  { %539 = vmatprep.subr.bf16.mxu1 %v843_v31  ;;  %v870_v0 = vld [vmem:[#allocation7 + $0xd4] ss:$8 sps:$4 sm:$0xff]   ;;  %v872_v1 = vld [vmem:[#allocation7 + $0xd0] ss:$8 sps:$4 sm:$0xff]   ;;  %v873_v2 = vld [vmem:[#allocation7 + $0xe4] ss:$8 sps:$4 sm:$0xff]  }
  0x4e   :  { %289 = vmatpush1.bf16.msra.mxu0 %v800_v11  ;;  %v875_v3 = vld [vmem:[#allocation7 + $0xe0] ss:$8 sps:$4 sm:$0xff]   ;;  %v876_v4 = vld [vmem:[#allocation7 + $0xf4] ss:$8 sps:$4 sm:$0xff]   ;;  %v878_v5 = vld [vmem:[#allocation7 + $0xf0] ss:$8 sps:$4 sm:$0xff]  }
  0x4f   :  { %290 = vmatprep.subr.bf16.mxu0 %v801_v12  ;;  %v110_v8 = vsub.s32 0, %v109_v7  ;;  %v106_v9 = vld [vmem:[%s1143_s3] sm:$0x3]  ;;  %v114_v10 = vsub.s32 1, %v109_v7  ;;  %v589_v29 = vld [vmem:[%s1141_s1 + $0x8] sm:$0xff] }
  0x50   :  { %540 = vmatpush1.bf16.msra.mxu1 %v845_v33  ;;  %v588_v27 = vld [vmem:[%s1141_s1] sm:$0xff]  ;;  %s1017_s1 = smov [#allocation8]  }
  0x51   :  { %541 = vmatprep.subr.bf16.mxu1 %v846_v35  ;;  %v111_v11 = vrot.slane %v106_v9, %v110_v8  ;;  %v115_v12 = vrot.slane %v106_v9, %v114_v10 }
  0x52   :  { %291 = vmatpush1.bf16.msra.mxu0 %v803_v15 }
  0x53   :  { %292 = vmatprep.subr.bf16.mxu0 %v804_v16 }
  0x54   :  { %542 = vmatpush1.bf16.msra.mxu1 %v848_v37 }
  0x55   :  { %543 = vmatprep.subr.bf16.mxu1 %v849_v39 }
  0x56   :  { %293 = vmatpush1.bf16.msra.mxu0 %v806_v22 }
  0x57   :  { %294 = vmatprep.subr.bf16.mxu0 %v807_v24 }
  0x58   :  { %544 = vmatpush1.bf16.msra.mxu1 %v851_v41 }
  0x59   :  { %545 = vmatprep.subr.bf16.mxu1 %v852_v43 }
  0x5a   :  { %295 = vmatpush1.bf16.msra.mxu0 %v809_v26 }
  0x5b   :  { %296 = vmatprep.subr.bf16.mxu0 %v810_v28  ;;  %v1016_v28 = vmov 0  }
  0x5c   :  { %546 = vmatpush1.bf16.msra.mxu1 %v854_v45  ;;  %781 = vset.pattern.permute.xlu1 %v1016_v28 }
  0x5d   :  { %547 = vmatprep.subr.bf16.mxu1 %v855_v47  ;;  %782 = vset.pattern.permute.xlu0 %v1016_v28 }
  0x5e   :  { %297 = vmatpush1.bf16.msra.mxu0 %v812_v30  ;;  %622 = vperm.xlu1 %781, %v588_v27   ;;  %v359_v30 = vld [vmem:[%s1145_s5] sm:$0x3]  ;;  %s674_s5 = sshll.u32 %s1017_s1, 4  ;;  %s675_s5 = int_to_ptr.vmem [resolvable:$true] %s674_s5 }
  0x5f   :  { %298 = vmatprep.subr.bf16.mxu0 %v813_v32  ;;  %v364_v31 = vrot.slane %v359_v30, %v110_v8  ;;  %v368_v32 = vrot.slane %v359_v30, %v114_v10  ;;  %s957_s24 = scalar_lea.vmem %s675_s5, 256  ;;  %p962_p11 = scmp.lt.s32.totalorder %s675_s5, %s675_s5 }
  0x60   :  { %548 = vmatpush1.bf16.msra.mxu1 %v857_v49  ;;  %p958_p10 = scmp.ne.s32.totalorder %s675_s5, %s957_s24  ;;  %p963_p12 = scmp.lt.s32.totalorder %s957_s24, %s957_s24 }
  0x61   :  { %549 = vmatprep.subr.bf16.mxu1 %v858_v51 }
  0x62   :  { %299 = vmatpush1.bf16.msra.mxu0 %v815_v34  ;;  %625 = vperm.xlu1 %781, %v589_v29   ;;  %p964_p13 = por %p963_p12, %p962_p11 }
  0x63   :  { %300 = vmatprep.subr.bf16.mxu0 %v816_v36 }
  0x64   :  { %550 = vmatpush1.bf16.msra.mxu1 %v860_v54  ;;  %p965_p0 = pnand %p964_p13, %p958_p10 }
  0x65   :  { %551 = vmatprep.subr.bf16.mxu1 %v861_v57 }
  0x66   :  { %301 = vmatpush1.bf16.msra.mxu0 %v818_v38 }
  0x67   :  { %302 = vmatprep.subr.bf16.mxu0 %v819_v40 }
  0x68   :  { %552 = vmatpush1.bf16.msra.mxu1 %v863_v59 }
  0x69   :  { %553 = vmatprep.subr.bf16.mxu1 %v864_v60 }
  0x6a   :  { %303 = vmatpush1.bf16.msra.mxu0 %v821_v42 }
  0x6b   :  { %304 = vmatprep.subr.bf16.mxu0 %v822_v44 }
  0x6c   :  { %554 = vmatpush1.bf16.msra.mxu1 %v866_v61 }
  0x6d   :  { %555 = vmatprep.subr.bf16.mxu1 %v867_v62 }
  0x6e   :  { %305 = vmatpush1.bf16.msra.mxu0 %v824_v46 }
  0x6f   :  { %306 = vmatprep.subr.bf16.mxu0 %v825_v48 }
  0x70   :  { %556 = vmatpush1.bf16.msra.mxu1 %v869_v63 }
  0x71   :  { %557 = vmatprep.subr.bf16.mxu1 %v870_v0 }
  0x72   :  { %307 = vmatpush1.bf16.msra.mxu0 %v827_v50 }
  0x73   :  { %308 = vmatprep.subr.bf16.mxu0 %v828_v52 }
  0x74   :  { %558 = vmatpush1.bf16.msra.mxu1 %v872_v1 }
  0x75   :  { %559 = vmatprep.subr.bf16.mxu1 %v873_v2 }
  0x76   :  { %309 = vmatpush1.bf16.msra.mxu0 %v830_v53  ;;  %v619_v53 = vand.u32 127, %v108_v6 }
  0x78   :  { %560 = vmatpush1.bf16.msra.mxu1 %v875_v3  ;;  %v620_v57 = vadd.s32 128, %v619_v53 }
  0x79   :  { %311 = vmatmul.mubr.bf16.vlgmr.msra.gmra.mrb[0].mxu0 %v72_v58  ;;  %561 = vmatprep.subr.bf16.mxu1 %v876_v4 }
  0x7c   :  { %562 = vmatpush1.bf16.msra.mxu1 %v878_v5 }
  0xdd   :  { %v623_v56 = vpop.permute.xlu1 %622 }
  0xde   :  { %vm627_vm0 = vcmp.eq.s32.totalorder %v619_v53, %v623_v56  ;;  %vm628_vm1 = vcmp.eq.s32.totalorder %v620_v57, %v623_v56 }
  0xe1   :  { %v626_v60 = vpop.permute.xlu1 %625 }
  0xe2   :  { %vm629_vm2 = vcmp.eq.s32.totalorder %v619_v53, %v626_v60  ;;  %vm630_vm3 = vcmp.eq.s32.totalorder %v620_v57, %v626_v60 }
 0x14c   :  { %v312_v13 = vpop.f32.mrb[0].mxu0 }
 0x14d   :  { %v313_v14 = vadd.f32 %v312_v13, %v111_v11  ;;  %v314_v15 = vpop.f32.mrb[1].mxu0 }
 0x14e   :  { %v315_v16 = vadd.f32 %v314_v15, %v115_v12  ;;  %v316_v17 = vpop.f32.mrb[2].mxu0 }
 0x14f   :  { %v317_v18 = vadd.f32 %v316_v17, %v111_v11  ;;  %v318_v19 = vpop.f32.mrb[3].mxu0  ;;  %v321_v21 = vmax.f32 %v313_v14, 0.0 }
 0x150   :  { %v319_v20 = vadd.f32 %v318_v19, %v115_v12  ;;  %v322_v23 = vmax.f32 %v315_v16, 0.0 }
 0x151   :  { %v323_v22 = vmax.f32 %v317_v18, 0.0 }
 0x152   :  { %v324_v24 = vmax.f32 %v319_v20, 0.0 }
 0x153   :  { %v325_v25 = vpack.c.bf16 %v323_v22, %v321_v21 }
 0x154   :  { %v326_v26 = vpack.c.bf16 %v324_v24, %v322_v23 }
 0x156   :  { %563 = vmatprep.mubr.bf16.mxu1 %v326_v26 }
 0x157   :  { %564 = vmatmul.mubr.bf16.vlgmr.msra.gmra.mrb[0].mxu1 %v325_v25 }
 0x22a   :  { %v565_v33 = vpop.f32.mrb[0].mxu1 }
 0x22b   :  { %v566_v34 = vadd.f32 %v565_v33, %v364_v31  ;;  %v567_v35 = vpop.f32.mrb[1].mxu1 }
 0x22c   :  { %v568_v36 = vadd.f32 %v567_v35, %v368_v32  ;;  %v569_v37 = vpop.f32.mrb[2].mxu1 }
 0x22d   :  { %v570_v38 = vadd.f32 %v569_v37, %v364_v31  ;;  %v571_v39 = vpop.f32.mrb[3].mxu1 }
 0x22e   :  { %v767_v40 = vpack.c.bf16 %v568_v36, %v566_v34  ;;  %v572_v41 = vadd.f32 %v571_v39, %v368_v32  ;;  %v590_v42 = vmax.f32 %v566_v34, %v568_v36 }
 0x230   :  { %586 = vst [vmem:[#allocation8] sm:$0xff] %v767_v40  ;;  %v768_v43 = vpack.c.bf16 %v572_v41, %v570_v38  ;;  %591 = vmax.xlane.f32.xlu0 %v590_v42  ;;  %v593_v44 = vmax.f32 %v570_v38, %v572_v41 }
 0x232   :  { %587 = vst [vmem:[#allocation8 + $0x8] sm:$0xff] %v768_v43 }
 0x234   :  { %594 = vmax.xlane.f32.xlu0 %v593_v44 }
 0x2bd   :  { %v592_v45 = vpop.xlane.xlu0 %591 }
 0x2be   :  { %v596_v46 = vsub.f32 %v566_v34, %v592_v45  ;;  %v597_v47 = vsub.f32 %v568_v36, %v592_v45 }
 0x2c0   :  { %v600_v48 = vmul.f32 1.442695, %v596_v46  ;;  %v602_v49 = vmul.f32 1.442695, %v597_v47  ;;  %v631_v62 = vsel %vm627_vm0, %v596_v46, 0.0  ;;  %v632_v63 = vsel %vm628_vm1, %v597_v47, 0.0 }
 0x2c1   :  { %v595_v50 = vpop.xlane.xlu0 %594  ;;  %v635_v2 = vadd.f32 %v632_v63, %v631_v62 }
 0x2c2   :  { %879 = vpow2.f32 %v600_v48  ;;  %v598_v51 = vsub.f32 %v570_v38, %v595_v50  ;;  %v599_v52 = vsub.f32 %v572_v41, %v595_v50 }
 0x2c3   :  { %881 = vpow2.f32 %v602_v49 }
 0x2c4   :  { %v604_v54 = vmul.f32 1.442695, %v598_v51  ;;  %v606_v55 = vmul.f32 1.442695, %v599_v52  ;;  %v633_v4 = vsel %vm629_vm2, %v598_v51, 0.0  ;;  %v634_v5 = vsel %vm630_vm3, %v599_v52, 0.0 }
 0x2c5   :  { %v638_v6 = vadd.f32 %v634_v5, %v633_v4 }
 0x2c6   :  { %883 = vpow2.f32 %v604_v54 }
 0x2c7   :  { %885 = vpow2.f32 %v606_v55 }
 0x2cc   :  { %v880_v58 = vpop.eup %879 }
 0x2cd   :  { %v882_v59 = vpop.eup %881 }
 0x2ce   :  { %v608_v61 = vadd.f32 %v882_v59, %v880_v58 }
 0x2d0   :  { %v884_v0 = vpop.eup %883  ;;  %609 = vadd.xlane.f32.xlu0 %v608_v61 }
 0x2d1   :  { %v886_v1 = vpop.eup %885 }
 0x2d2   :  { %v611_v3 = vadd.f32 %v886_v1, %v884_v0 }
 0x2d4   :  { %636 = vadd.xlane.f32.xlu0 %v635_v2  ;;  %612 = vadd.xlane.f32.xlu1 %v611_v3 }
 0x2d8   :  { %639 = vadd.xlane.f32.xlu0 %v638_v6 }
 0x35d   :  { %v610_v7 = vpop.xlane.xlu0 %609 }
 0x35e   :  { %887 = vlog2.f32 %v610_v7 }
 0x361   :  { %v613_v8 = vpop.xlane.xlu1 %612  ;;  %v637_v10 = vpop.xlane.xlu0 %636 }
 0x362   :  { %889 = vlog2.f32 %v613_v8 }
 0x365   :  { %v640_v15 = vpop.xlane.xlu0 %639 }
 0x368   :  { %v888_v9 = vpop.eup %887 }
 0x369   :  { %v615_v11 = vmul.f32 0.6931472, %v888_v9 }
 0x36b   :  { %v641_v13 = vsub.f32 %v615_v11, %v637_v10 }
 0x36c   :  { %v890_v12 = vpop.eup %889 }
 0x36d   :  { %v617_v14 = vmul.f32 0.6931472, %v890_v12  ;;  %v655_v17 = vsel %vm654_vm4, %v641_v13, 0.0 }
 0x36f   :  { %v642_v16 = vsub.f32 %v617_v14, %v640_v15 }
 0x371   :  { %v656_v18 = vsel %vm654_vm4, %v642_v16, 0.0 }
 0x372   :  { %v657_v19 = vadd.f32 %v656_v18, %v655_v17 }
 0x374   :  { %658 = vadd.xlane.f32.xlu0 %v657_v19 }
 0x375   :  { %968 = shalt.err (!%p965_p0)
}
 0x376   :  { %s969_s26 = scalar_lea.hbm %s1146_s6, 256 }
 0x377   :  { %p970_p1 = scmp.ne.s32.totalorder %s1146_s6, %s969_s26  ;;  %p973_p2 = scmp.lt.u32.totalorder %s969_s26, %s1146_s6 }
 0x379   :  { %p975_p3 = pnand %p973_p2, %p970_p1 }
 0x37b   :  { %978 = shalt.err (!%p975_p3)
}
 0x37c   :  { %680 = dma.vmem_to_hbm [thread:$0]  %s675_s5, 256, %s1146_s6, [#allocation4], %s1010_s11, %s1010_s11, %s1011_s12  }
 0x37d   :  { %s1018_s10 = smov [#allocation9]  }
 0x37e   :  { %s687_s13 = sshll.u32 %s1018_s10, 4  ;;  %s688_s13 = int_to_ptr.vmem [resolvable:$true] %s687_s13 }
 0x37f   :  { %s979_s15 = scalar_lea.vmem %s688_s13, 16  ;;  %s983_s17 = scalar_lea.vmem %s688_s13, 32 }
 0x380   :  { %p980_p4 = scmp.ne.s32.totalorder %s688_s13, %s979_s15  ;;  %p984_p5 = scmp.lt.s32.totalorder %s688_s13, %s688_s13 }
 0x381   :  { %p985_p6 = scmp.lt.s32.totalorder %s983_s17, %s979_s15 }
 0x383   :  { %p986_p7 = por %p985_p6, %p984_p5 }
 0x385   :  { %p987_p8 = pnand %p986_p7, %p980_p4 }
 0x401   :  { %v659_v20 = vpop.xlane.xlu0 %658 }
 0x402   :  { %v660_v21 = vrot.slane %v659_v20, 4 }
 0x404   :  { %v661_v22 = vadd.f32 %v660_v21, %v659_v20 }
 0x406   :  { %v662_v23 = vrot.slane %v661_v22, 2 }
 0x408   :  { %v663_v24 = vadd.f32 %v662_v23, %v661_v22 }
 0x40a   :  { %v664_v25 = vrot.slane %v663_v24, 1 }
 0x40c   :  { %v665_v26 = vadd.f32 %v664_v25, %v663_v24 }
 0x40e   :  { %769 = vpush %v665_v26 }
 0x43f   :  { %s770_s14 = spop %769 }
 0x440   :  { %v667_v27 = vstv %s770_s14 }
 0x441   :  { %668 = vst [vmem:[#allocation9] sm:$0x1] %v667_v27 }
 0x442   :  { %990 = shalt.err (!%p987_p8)
}
 0x443   :  { %s991_s12 = scalar_lea.hbm %s1147_s7, 16 }
 0x444   :  { %p992_p9 = scmp.ne.s32.totalorder %s1147_s7, %s991_s12  ;;  %p995_p10 = scmp.lt.u32.totalorder %s991_s12, %s1147_s7 }
 0x446   :  { %p997_p11 = pnand %p995_p10, %p992_p9 }
 0x448   :  { %1000 = shalt.err (!%p997_p11)
}
 0x449   :  { %690 = dma.vmem_to_hbm [thread:$0]  %s688_s13, 16, %s1147_s7, [#allocation10]  }
 0x44a   :  { %1005 = dma.done.wait [#allocation4], 256  }
 0x44b   :  { %1006 = vsyncadd [#allocation4], 4294967040 }
 0x44c   :  { %1007 = dma.done.wait [#allocation10], 16  }
 0x44d   :  { %1008 = vsyncadd [#allocation10], 4294967280 }
 0x44e   :  { %697 = vsyncpa [#allocation3], 1 }
 0x44f   :  { %698 = vsyncpa [#allocation6], 1 }
 0x450   :  { %699 = vsyncpa [#allocation4], 1 }
 0x451   :  { %700 = vsyncpa [#allocation10], 1 }

</bundles_post_ra>
